<compile_context>
chip_gen: v7x
topology: tpu7x:2x2x1
jax: 0.10.0
libtpu: 0.0.40
codegen_flags: <defaults>
</compile_context>

<pallas_src>
import functools

import jax
import jax.numpy as jnp
from jax.experimental import pallas as pl
from jax.experimental.pallas import tpu as pltpu

NEG_BIG = -1e30     # online-softmax "minus infinity" (finite -> exp() underflows to exactly 0)
PAD_BIAS = -1e9     # bias for padded vocab columns -> their softmax weight is exactly 0


def _round_up(x, m):
    return (x + m - 1) // m * m


# --------------------------------------------------------------------------------------
# Fused kernel: LSTM cell (first grid step only) + streamed vocab projection
#               + online logsumexp + in-place log_softmax finalize (last grid step)
# --------------------------------------------------------------------------------------
def lstm_project_kernel(x_ref, h0_ref, c0_ref, wih_ref, whh_ref, b_ref,
                        wout_ref, bout_ref,
                        logp_ref, h_ref, c_ref,
                        h_scratch, m_scratch, l_scratch):
    j = pl.program_id(0)
    n_tiles = pl.num_programs(0)
    H = h0_ref.shape[1]            # padded hidden size (multiple of 128)
    TV = wout_ref.shape[1]         # vocab tile width (multiple of 128)

    @pl.when(j == 0)
    def _():
        # gates = x @ W_ih^T + h @ W_hh^T + (b_ih + b_hh); PyTorch gate order i, f, g, o
        gates = (jnp.dot(x_ref[...], wih_ref[...], preferred_element_type=jnp.float32)
                 + jnp.dot(h0_ref[...].astype(jnp.bfloat16), whh_ref[...],
                           preferred_element_type=jnp.float32)
                 + b_ref[...])
        i = jax.nn.sigmoid(gates[:, 0:H])
        f = jax.nn.sigmoid(gates[:, H:2 * H])
        g = jnp.tanh(gates[:, 2 * H:3 * H])
        o = jax.nn.sigmoid(gates[:, 3 * H:4 * H])
        c_new = f * c0_ref[...] + i * g
        h_new = o * jnp.tanh(c_new)
        h_ref[...] = h_new
        c_ref[...] = c_new
        h_scratch[...] = h_new.astype(jnp.bfloat16)     # bf16 scratch: no per-tile cast later
        m_scratch[...] = jnp.full_like(m_scratch, NEG_BIG)
        l_scratch[...] = jnp.zeros_like(l_scratch)

    # projection for this vocab tile: (B_pad, TV) = (B_pad, H_pad) @ (H_pad, TV)
    logits = (jnp.dot(h_scratch[...], wout_ref[...], preferred_element_type=jnp.float32)
              + bout_ref[...])
    col0 = pl.multiple_of(j * TV, 128)
    logp_ref[:, pl.ds(col0, TV)] = logits               # resident (B_pad, V_pad) output buffer

    # online logsumexp across vocab tiles
    m_prev = m_scratch[...]
    m_new = jnp.maximum(m_prev, jnp.max(logits, axis=1, keepdims=True))
    l_scratch[...] = (l_scratch[...] * jnp.exp(m_prev - m_new)
                      + jnp.sum(jnp.exp(logits - m_new), axis=1, keepdims=True))
    m_scratch[...] = m_new

    @pl.when(j == n_tiles - 1)
    def _():
        lse = m_scratch[...] + jnp.log(l_scratch[...])
        logp_ref[...] = logp_ref[...] - lse              # finalize log_softmax in VMEM, no 2nd pass


# --------------------------------------------------------------------------------------
# Parameter init / one-time preparation
# --------------------------------------------------------------------------------------
def init_params(key, vocab_size, embedding_size, hidden_size):
    """Deterministic synthetic init (shapes match nn.Embedding / nn.LSTM / nn.Linear)."""
    ks = jax.random.split(key, 7)
    k_lstm = 1.0 / jnp.sqrt(hidden_size)
    k_lin = 1.0 / jnp.sqrt(hidden_size)
    return {
        "embedding": jax.random.normal(ks[0], (vocab_size, embedding_size), jnp.float32),
        "w_ih": jax.random.uniform(ks[1], (4 * hidden_size, embedding_size), jnp.float32, -k_lstm, k_lstm),
        "w_hh": jax.random.uniform(ks[2], (4 * hidden_size, hidden_size), jnp.float32, -k_lstm, k_lstm),
        "b_ih": jax.random.uniform(ks[3], (4 * hidden_size,), jnp.float32, -k_lstm, k_lstm),
        "b_hh": jax.random.uniform(ks[4], (4 * hidden_size,), jnp.float32, -k_lstm, k_lstm),
        "w_out": jax.random.uniform(ks[5], (vocab_size, hidden_size), jnp.float32, -k_lin, k_lin),
        "b_out": jax.random.uniform(ks[6], (vocab_size,), jnp.float32, -k_lin, k_lin),
    }


def prepare_params(params, *, tv=None, lane=128):
    """One-time (per model, NOT per token) transpose / pad / bf16 cast of weights + embedding."""
    V, E = params["embedding"].shape
    H = params["w_hh"].shape[1]
    E_pad = _round_up(E, lane)
    H_pad = _round_up(H, lane)

    if tv is None:
        v_lane = _round_up(V, lane)
        # small vocab: single tile (no streaming); large vocab: 2048-wide streamed W_out^T tiles
        tv = v_lane if v_lane <= 4096 else 2048
    V_pad = _round_up(V, tv)

    def pad_gate_cols(w_t, rows, rows_pad):
        # w_t: (rows, 4H) in gate order i,f,g,o -> (rows_pad, 4*H_pad), each gate padded to H_pad
        w4 = w_t.reshape(rows, 4, H)
        w4 = jnp.pad(w4, ((0, rows_pad - rows), (0, 0), (0, H_pad - H)))
        return w4.reshape(rows_pad, 4 * H_pad)

    w_ih_t = pad_gate_cols(params["w_ih"].T, E, E_pad).astype(jnp.bfloat16)   # (E_pad, 4H_pad)
    w_hh_t = pad_gate_cols(params["w_hh"].T, H, H_pad).astype(jnp.bfloat16)   # (H_pad, 4H_pad)
    b = (params["b_ih"] + params["b_hh"]).reshape(1, 4, H)
    b = jnp.pad(b, ((0, 0), (0, 0), (0, H_pad - H))).reshape(1, 4 * H_pad).astype(jnp.float32)

    w_out_t = jnp.pad(params["w_out"].T, ((0, H_pad - H), (0, V_pad - V))).astype(jnp.bfloat16)
    b_out = jnp.pad(params["b_out"].reshape(1, V), ((0, 0), (0, V_pad - V)),
                    constant_values=PAD_BIAS).astype(jnp.float32)

    # embedding pre-padded to E_pad lanes and pre-cast to bf16 -> gather yields MXU-ready rows
    emb = jnp.pad(params["embedding"], ((0, 0), (0, E_pad - E))).astype(jnp.bfloat16)

    return {
        "embedding": emb,
        "w_ih_t": w_ih_t, "w_hh_t": w_hh_t, "b": b,
        "w_out_t": w_out_t, "b_out": b_out,
        "E": E, "H": H, "V": V,
        "E_pad": E_pad, "H_pad": H_pad, "V_pad": V_pad, "tv": tv,
    }


# --------------------------------------------------------------------------------------
# Forward (one decode step)
# --------------------------------------------------------------------------------------
def decoder_rnn_forward(prep, input_ids, hidden):
    """input_ids: (B, 1) int32 token ids; hidden: (h0, c0) each (1, B, H)."""
    h0, c0 = hidden
    B = h0.shape[1]
    H, V = prep["H"], prep["V"]
    E_pad, H_pad, V_pad, TV = prep["E_pad"], prep["H_pad"], prep["V_pad"], prep["tv"]
    B_pad = _round_up(B, 8)
    n_tiles = V_pad // TV

    # embedding lookup (gather) is JAX glue; the table is already (V, E_pad) bf16
    x = prep["embedding"][input_ids[:, 0]]                             # (B, E_pad) bf16
    x = jnp.pad(x, ((0, B_pad - B), (0, 0)))                           # (B_pad, E_pad)
    h0p = jnp.pad(h0[0], ((0, B_pad - B), (0, H_pad - H)))             # (B_pad, H_pad) f32
    c0p = jnp.pad(c0[0], ((0, B_pad - B), (0, H_pad - H)))

    resident = lambda r, c: pl.BlockSpec((r, c), lambda j: (0, 0))

    logp_pad, h_new, c_new = pl.pallas_call(
        lstm_project_kernel,
        out_shape=(jax.ShapeDtypeStruct((B_pad, V_pad), jnp.float32),
                   jax.ShapeDtypeStruct((B_pad, H_pad), jnp.float32),
                   jax.ShapeDtypeStruct((B_pad, H_pad), jnp.float32)),
        grid_spec=pltpu.PrefetchScalarGridSpec(
            num_scalar_prefetch=0,
            grid=(n_tiles,),
            in_specs=[
                resident(B_pad, E_pad),                          # x (bf16)
                resident(B_pad, H_pad),                          # h0 (f32)
                resident(B_pad, H_pad),                          # c0 (f32)
                resident(E_pad, 4 * H_pad),                      # W_ih^T (bf16)
                resident(H_pad, 4 * H_pad),                      # W_hh^T (bf16)
                resident(1, 4 * H_pad),                          # b_ih + b_hh (f32)
                pl.BlockSpec((H_pad, TV), lambda j: (0, j)),     # W_out^T, streamed per vocab tile
                pl.BlockSpec((1, TV), lambda j: (0, j)),         # b_out, streamed per vocab tile
            ],
            out_specs=(
                resident(B_pad, V_pad),                          # logp: VMEM-resident across the grid
                resident(B_pad, H_pad),                          # h_new
                resident(B_pad, H_pad),                          # c_new
            ),
            scratch_shapes=[
                pltpu.VMEM((B_pad, H_pad), jnp.bfloat16),        # h (bf16), reused by every tile's matmul
                pltpu.VMEM((B_pad, 1), jnp.float32),             # running max
                pltpu.VMEM((B_pad, 1), jnp.float32),             # running sum
            ]),
        input_output_aliases={1: 1, 2: 2},                       # h0p -> h_new, c0p -> c_new
        compiler_params=pltpu.CompilerParams(
            dimension_semantics=("arbitrary",),                  # vocab axis carries lse + resident logp
            vmem_limit_bytes=32 * 1024 * 1024),
    )(x, h0p, c0p, prep["w_ih_t"], prep["w_hh_t"], prep["b"], prep["w_out_t"], prep["b_out"])

    logp = logp_pad[:B, :V]
    return logp, (h_new[:B, :H][None, ...], c_new[:B, :H][None, ...])


# --------------------------------------------------------------------------------------
# Pure-JAX reference mirroring the PyTorch forward (same bf16 rounding as the kernel path)
# --------------------------------------------------------------------------------------
def reference_forward(params, input_ids, hidden):
    h0, c0 = hidden
    H = h0.shape[2]
    bf = jnp.bfloat16
    x = params["embedding"][input_ids[:, 0]].astype(bf)
    gates = (jnp.dot(x, params["w_ih"].T.astype(bf), preferred_element_type=jnp.float32)
             + jnp.dot(h0[0].astype(bf), params["w_hh"].T.astype(bf),
                       preferred_element_type=jnp.float32)
             + params["b_ih"] + params["b_hh"])
    i = jax.nn.sigmoid(gates[:, 0:H])
    f = jax.nn.sigmoid(gates[:, H:2 * H])
    g = jnp.tanh(gates[:, 2 * H:3 * H])
    o = jax.nn.sigmoid(gates[:, 3 * H:4 * H])
    c = f * c0[0] + i * g
    h = o * jnp.tanh(c)
    logits = (jnp.dot(h.astype(bf), params["w_out"].T.astype(bf),
                      preferred_element_type=jnp.float32) + params["b_out"])
    logp = jax.nn.log_softmax(logits, axis=1)
    return logp, (h[None, ...], c[None, ...])


if __name__ == "__main__":
    vocab_size, embedding_size, hidden_size = 1000, 48, 80
    batch = 2

    key = jax.random.PRNGKey(0)
    kp, ki, kh, kc = jax.random.split(key, 4)

    params = init_params(kp, vocab_size, embedding_size, hidden_size)
    prep = prepare_params(params)          # V_pad = 1024 -> TV = 1024, single vocab tile (n_tiles = 1)

    input_ids = jax.random.randint(ki, (batch, 1), 0, vocab_size, dtype=jnp.int32)
    h0 = jax.random.normal(kh, (1, batch, hidden_size), jnp.float32)
    c0 = jax.random.normal(kc, (1, batch, hidden_size), jnp.float32)

    fwd = jax.jit(functools.partial(decoder_rnn_forward, prep))
    logp, (h_new, c_new) = fwd(input_ids, (h0, c0))
    jax.block_until_ready((logp, h_new, c_new))

    ref_logp, (ref_h, ref_c) = reference_forward(params, input_ids, (h0, c0))
    assert logp.shape == (batch, vocab_size)
    assert h_new.shape == (1, batch, hidden_size) and c_new.shape == (1, batch, hidden_size)
    # both paths use bf16 weights/activations with f32 accumulation; tolerance covers
    # transcendental-lowering and tile-wise accumulation-order differences
    assert jnp.allclose(logp, ref_logp, atol=1e-3, rtol=1e-3)
    assert jnp.allclose(h_new, ref_h, atol=1e-3, rtol=1e-3)
    assert jnp.allclose(c_new, ref_c, atol=1e-3, rtol=1e-3)

    print("KERNEL_OK")
</pallas_src>

<mosaic_0001>
module attributes {stable_mosaic.version = 11 : i64} {
  func.func @lstm_project_kernel(%arg0: i32, %arg1: memref<8x128xbf16, #tpu.memory_space<vmem>>, %arg2: memref<8x128xf32, #tpu.memory_space<vmem>>, %arg3: memref<8x128xf32, #tpu.memory_space<vmem>>, %arg4: memref<128x512xbf16, #tpu.memory_space<vmem>>, %arg5: memref<128x512xbf16, #tpu.memory_space<vmem>>, %arg6: memref<1x512xf32, #tpu.memory_space<vmem>>, %arg7: memref<128x1024xbf16, #tpu.memory_space<vmem>>, %arg8: memref<1x1024xf32, #tpu.memory_space<vmem>>, %arg9: memref<8x1024xf32, #tpu.memory_space<vmem>>, %arg10: memref<8x128xf32, #tpu.memory_space<vmem>>, %arg11: memref<8x128xf32, #tpu.memory_space<vmem>>, %arg12: memref<8x128xbf16, #tpu.memory_space<vmem>>, %arg13: memref<8x1xf32, #tpu.memory_space<vmem>>, %arg14: memref<8x1xf32, #tpu.memory_space<vmem>>) attributes {dimension_semantics = [#tpu.dimension_semantics<arbitrary>], iteration_bounds = array<i64: 1>, scalar_prefetch = 0 : i64, scratch_operands = 3 : i64, tpu.core_type = #tpu.core_type<tc>, window_params = [{pipeline_mode = #tpu.pipeline_mode<synchronous>, transform_indices = @transform_0, window_bounds = array<i64: 8, 128>}, {pipeline_mode = #tpu.pipeline_mode<synchronous>, transform_indices = @transform_1, window_bounds = array<i64: 8, 128>}, {pipeline_mode = #tpu.pipeline_mode<synchronous>, transform_indices = @transform_2, window_bounds = array<i64: 8, 128>}, {pipeline_mode = #tpu.pipeline_mode<synchronous>, transform_indices = @transform_3, window_bounds = array<i64: 128, 512>}, {pipeline_mode = #tpu.pipeline_mode<synchronous>, transform_indices = @transform_4, window_bounds = array<i64: 128, 512>}, {pipeline_mode = #tpu.pipeline_mode<synchronous>, transform_indices = @transform_5, window_bounds = array<i64: 1, 512>}, {transform_indices = @transform_6, window_bounds = array<i64: 128, 1024>}, {transform_indices = @transform_7, window_bounds = array<i64: 1, 1024>}, {pipeline_mode = #tpu.pipeline_mode<synchronous>, transform_indices = @transform_8, window_bounds = array<i64: 8, 1024>}, {pipeline_mode = #tpu.pipeline_mode<synchronous>, transform_indices = @transform_9, window_bounds = array<i64: 8, 128>}, {pipeline_mode = #tpu.pipeline_mode<synchronous>, transform_indices = @transform_10, window_bounds = array<i64: 8, 128>}]} {
    %c0_i32 = arith.constant 0 : i32
    %0 = arith.cmpi eq, %arg0, %c0_i32 : i32
    %1 = arith.extui %0 : i1 to i32
    %c0_i32_0 = arith.constant 0 : i32
    %2 = arith.cmpi ne, %1, %c0_i32_0 : i32
    scf.if %2 {
      %c0_19 = arith.constant 0 : index
      %c0_20 = arith.constant 0 : index
      %32 = vector.load %arg1[%c0_19, %c0_20] : memref<8x128xbf16, #tpu.memory_space<vmem>>, vector<8x128xbf16>
      %c0_21 = arith.constant 0 : index
      %c0_22 = arith.constant 0 : index
      %33 = vector.load %arg4[%c0_21, %c0_22] : memref<128x512xbf16, #tpu.memory_space<vmem>>, vector<128x512xbf16>
      %cst_23 = arith.constant dense<0.000000e+00> : vector<8x512xf32>
      %34 = tpu.matmul %32, %33, %cst_23 {dimension_numbers = #tpu.dot_dimension_numbers<[1], [0], [0], [1], [0, 0, 1, 1], [], []>} : vector<8x128xbf16>, vector<128x512xbf16>, vector<8x512xf32> -> vector<8x512xf32>
      %c0_24 = arith.constant 0 : index
      %c0_25 = arith.constant 0 : index
      %35 = vector.load %arg2[%c0_24, %c0_25] : memref<8x128xf32, #tpu.memory_space<vmem>>, vector<8x128xf32>
      %36 = arith.truncf %35 : vector<8x128xf32> to vector<8x128xbf16>
      %c0_26 = arith.constant 0 : index
      %c0_27 = arith.constant 0 : index
      %37 = vector.load %arg5[%c0_26, %c0_27] : memref<128x512xbf16, #tpu.memory_space<vmem>>, vector<128x512xbf16>
      %cst_28 = arith.constant dense<0.000000e+00> : vector<8x512xf32>
      %38 = tpu.matmul %36, %37, %cst_28 {dimension_numbers = #tpu.dot_dimension_numbers<[1], [0], [0], [1], [0, 0, 1, 1], [], []>} : vector<8x128xbf16>, vector<128x512xbf16>, vector<8x512xf32> -> vector<8x512xf32>
      %39 = arith.addf %34, %38 : vector<8x512xf32>
      %c0_29 = arith.constant 0 : index
      %c0_30 = arith.constant 0 : index
      %40 = vector.load %arg6[%c0_29, %c0_30] : memref<1x512xf32, #tpu.memory_space<vmem>>, vector<1x512xf32>
      %41 = vector.broadcast %40 : vector<1x512xf32> to vector<8x512xf32>
      %42 = arith.addf %39, %41 : vector<8x512xf32>
      %43 = vector.extract_strided_slice %42 {offsets = [0, 0], sizes = [8, 128], strides = [1, 1]} : vector<8x512xf32> to vector<8x128xf32>
      %44 = arith.negf %43 : vector<8x128xf32>
      %45 = math.exp %44 : vector<8x128xf32>
      %cst_31 = arith.constant 1.000000e+00 : f32
      %46 = vector.broadcast %cst_31 : f32 to vector<8x128xf32>
      %47 = arith.addf %46, %45 : vector<8x128xf32>
      %48 = arith.divf %46, %47 : vector<8x128xf32>
      %49 = vector.extract_strided_slice %42 {offsets = [0, 128], sizes = [8, 128], strides = [1, 1]} : vector<8x512xf32> to vector<8x128xf32>
      %50 = arith.negf %49 : vector<8x128xf32>
      %51 = math.exp %50 : vector<8x128xf32>
      %cst_32 = arith.constant 1.000000e+00 : f32
      %52 = vector.broadcast %cst_32 : f32 to vector<8x128xf32>
      %53 = arith.addf %52, %51 : vector<8x128xf32>
      %54 = arith.divf %52, %53 : vector<8x128xf32>
      %55 = vector.extract_strided_slice %42 {offsets = [0, 256], sizes = [8, 128], strides = [1, 1]} : vector<8x512xf32> to vector<8x128xf32>
      %56 = math.tanh %55 : vector<8x128xf32>
      %57 = vector.extract_strided_slice %42 {offsets = [0, 384], sizes = [8, 128], strides = [1, 1]} : vector<8x512xf32> to vector<8x128xf32>
      %58 = arith.negf %57 : vector<8x128xf32>
      %59 = math.exp %58 : vector<8x128xf32>
      %cst_33 = arith.constant 1.000000e+00 : f32
      %60 = vector.broadcast %cst_33 : f32 to vector<8x128xf32>
      %61 = arith.addf %60, %59 : vector<8x128xf32>
      %62 = arith.divf %60, %61 : vector<8x128xf32>
      %c0_34 = arith.constant 0 : index
      %c0_35 = arith.constant 0 : index
      %63 = vector.load %arg3[%c0_34, %c0_35] : memref<8x128xf32, #tpu.memory_space<vmem>>, vector<8x128xf32>
      %64 = arith.mulf %54, %63 : vector<8x128xf32>
      %65 = arith.mulf %48, %56 : vector<8x128xf32>
      %66 = arith.addf %64, %65 : vector<8x128xf32>
      %67 = math.tanh %66 : vector<8x128xf32>
      %68 = arith.mulf %62, %67 : vector<8x128xf32>
      %c0_36 = arith.constant 0 : index
      %c0_37 = arith.constant 0 : index
      %69 = vector.load %arg10[%c0_36, %c0_37] : memref<8x128xf32, #tpu.memory_space<vmem>>, vector<8x128xf32>
      tpu.vector_store %arg10[%c0_36, %c0_37], %68 {strides = array<i32>} : memref<8x128xf32, #tpu.memory_space<vmem>>, vector<8x128xf32>,
      %c0_38 = arith.constant 0 : index
      %c0_39 = arith.constant 0 : index
      %70 = vector.load %arg11[%c0_38, %c0_39] : memref<8x128xf32, #tpu.memory_space<vmem>>, vector<8x128xf32>
      tpu.vector_store %arg11[%c0_38, %c0_39], %66 {strides = array<i32>} : memref<8x128xf32, #tpu.memory_space<vmem>>, vector<8x128xf32>,
      %71 = arith.truncf %68 : vector<8x128xf32> to vector<8x128xbf16>
      %c0_40 = arith.constant 0 : index
      %c0_41 = arith.constant 0 : index
      %72 = vector.load %arg12[%c0_40, %c0_41] : memref<8x128xbf16, #tpu.memory_space<vmem>>, vector<8x128xbf16>
      tpu.vector_store %arg12[%c0_40, %c0_41], %71 {strides = array<i32>} : memref<8x128xbf16, #tpu.memory_space<vmem>>, vector<8x128xbf16>,
      %cst_42 = arith.constant -1.000000e+30 : f32
      %73 = vector.broadcast %cst_42 : f32 to vector<8x1xf32>
      %c0_43 = arith.constant 0 : index
      %c0_44 = arith.constant 0 : index
      %74 = vector.load %arg13[%c0_43, %c0_44] : memref<8x1xf32, #tpu.memory_space<vmem>>, vector<8x1xf32>
      tpu.vector_store %arg13[%c0_43, %c0_44], %73 {strides = array<i32>} : memref<8x1xf32, #tpu.memory_space<vmem>>, vector<8x1xf32>,
      %cst_45 = arith.constant 0.000000e+00 : f32
      %75 = vector.broadcast %cst_45 : f32 to vector<8x1xf32>
      %c0_46 = arith.constant 0 : index
      %c0_47 = arith.constant 0 : index
      %76 = vector.load %arg14[%c0_46, %c0_47] : memref<8x1xf32, #tpu.memory_space<vmem>>, vector<8x1xf32>
      tpu.vector_store %arg14[%c0_46, %c0_47], %75 {strides = array<i32>} : memref<8x1xf32, #tpu.memory_space<vmem>>, vector<8x1xf32>,
    } else {
    }
    %c0 = arith.constant 0 : index
    %c0_1 = arith.constant 0 : index
    %3 = vector.load %arg12[%c0, %c0_1] : memref<8x128xbf16, #tpu.memory_space<vmem>>, vector<8x128xbf16>
    %c0_2 = arith.constant 0 : index
    %c0_3 = arith.constant 0 : index
    %4 = vector.load %arg7[%c0_2, %c0_3] : memref<128x1024xbf16, #tpu.memory_space<vmem>>, vector<128x1024xbf16>
    %cst = arith.constant dense<0.000000e+00> : vector<8x1024xf32>
    %5 = tpu.matmul %3, %4, %cst {dimension_numbers = #tpu.dot_dimension_numbers<[1], [0], [0], [1], [0, 0, 1, 1], [], []>} : vector<8x128xbf16>, vector<128x1024xbf16>, vector<8x1024xf32> -> vector<8x1024xf32>
    %c0_4 = arith.constant 0 : index
    %c0_5 = arith.constant 0 : index
    %6 = vector.load %arg8[%c0_4, %c0_5] : memref<1x1024xf32, #tpu.memory_space<vmem>>, vector<1x1024xf32>
    %7 = vector.broadcast %6 : vector<1x1024xf32> to vector<8x1024xf32>
    %8 = arith.addf %5, %7 : vector<8x1024xf32>
    %c1024_i32 = arith.constant 1024 : i32
    %9 = arith.muli %arg0, %c1024_i32 : i32
    %10 = tpu.assume_multiple %9, 128 : i32
    %c0_6 = arith.constant 0 : index
    %11 = arith.index_cast %10 : i32 to index
    %12 = vector.load %arg9[%c0_6, %11] : memref<8x1024xf32, #tpu.memory_space<vmem>>, vector<8x1024xf32>
    tpu.vector_store %arg9[%c0_6, %11], %8 {strides = array<i32>} : memref<8x1024xf32, #tpu.memory_space<vmem>>, vector<8x1024xf32>,
    %c0_7 = arith.constant 0 : index
    %c0_8 = arith.constant 0 : index
    %13 = vector.load %arg13[%c0_7, %c0_8] : memref<8x1xf32, #tpu.memory_space<vmem>>, vector<8x1xf32>
    %cst_9 = arith.constant dense<0xFF800000> : vector<8xf32>
    %14 = vector.multi_reduction <maximumf>, %8, %cst_9 [1] : vector<8x1024xf32> to vector<8xf32>
    %15 = vector.shape_cast %14 : vector<8xf32> to vector<8x1xf32>
    %16 = arith.maximumf %13, %15 : vector<8x1xf32>
    %c0_10 = arith.constant 0 : index
    %c0_11 = arith.constant 0 : index
    %17 = vector.load %arg14[%c0_10, %c0_11] : memref<8x1xf32, #tpu.memory_space<vmem>>, vector<8x1xf32>
    %18 = arith.subf %13, %16 : vector<8x1xf32>
    %19 = math.exp %18 : vector<8x1xf32>
    %20 = arith.mulf %17, %19 : vector<8x1xf32>
    %21 = vector.broadcast %16 : vector<8x1xf32> to vector<8x1024xf32>
    %22 = arith.subf %8, %21 : vector<8x1024xf32>
    %23 = math.exp %22 : vector<8x1024xf32>
    %cst_12 = arith.constant dense<0.000000e+00> : vector<8xf32>
    %24 = vector.multi_reduction <add>, %23, %cst_12 [1] : vector<8x1024xf32> to vector<8xf32>
    %25 = vector.shape_cast %24 : vector<8xf32> to vector<8x1xf32>
    %26 = arith.addf %20, %25 : vector<8x1xf32>
    %c0_13 = arith.constant 0 : index
    %c0_14 = arith.constant 0 : index
    %27 = vector.load %arg14[%c0_13, %c0_14] : memref<8x1xf32, #tpu.memory_space<vmem>>, vector<8x1xf32>
    tpu.vector_store %arg14[%c0_13, %c0_14], %26 {strides = array<i32>} : memref<8x1xf32, #tpu.memory_space<vmem>>, vector<8x1xf32>,
    %c0_15 = arith.constant 0 : index
    %c0_16 = arith.constant 0 : index
    %28 = vector.load %arg13[%c0_15, %c0_16] : memref<8x1xf32, #tpu.memory_space<vmem>>, vector<8x1xf32>
    tpu.vector_store %arg13[%c0_15, %c0_16], %16 {strides = array<i32>} : memref<8x1xf32, #tpu.memory_space<vmem>>, vector<8x1xf32>,
    %c0_i32_17 = arith.constant 0 : i32
    %29 = arith.cmpi eq, %arg0, %c0_i32_17 : i32
    %30 = arith.extui %29 : i1 to i32
    %c0_i32_18 = arith.constant 0 : i32
    %31 = arith.cmpi ne, %30, %c0_i32_18 : i32
    scf.if %31 {
      %c0_19 = arith.constant 0 : index
      %c0_20 = arith.constant 0 : index
      %32 = vector.load %arg13[%c0_19, %c0_20] : memref<8x1xf32, #tpu.memory_space<vmem>>, vector<8x1xf32>
      %c0_21 = arith.constant 0 : index
      %c0_22 = arith.constant 0 : index
      %33 = vector.load %arg14[%c0_21, %c0_22] : memref<8x1xf32, #tpu.memory_space<vmem>>, vector<8x1xf32>
      %34 = math.log %33 : vector<8x1xf32>
      %35 = arith.addf %32, %34 : vector<8x1xf32>
      %c0_23 = arith.constant 0 : index
      %c0_24 = arith.constant 0 : index
      %36 = vector.load %arg9[%c0_23, %c0_24] : memref<8x1024xf32, #tpu.memory_space<vmem>>, vector<8x1024xf32>
      %37 = vector.broadcast %35 : vector<8x1xf32> to vector<8x1024xf32>
      %38 = arith.subf %36, %37 : vector<8x1024xf32>
      %c0_25 = arith.constant 0 : index
      %c0_26 = arith.constant 0 : index
      %39 = vector.load %arg9[%c0_25, %c0_26] : memref<8x1024xf32, #tpu.memory_space<vmem>>, vector<8x1024xf32>
      tpu.vector_store %arg9[%c0_25, %c0_26], %38 {strides = array<i32>} : memref<8x1024xf32, #tpu.memory_space<vmem>>, vector<8x1024xf32>,
    } else {
    }
    return
  }
  func.func @transform_0(%arg0: i32) -> (i32, i32) {
    %c0_i32 = arith.constant 0 : i32
    %c0_i32_0 = arith.constant 0 : i32
    %c0_i32_1 = arith.constant 0 : i32
    return %c0_i32, %c0_i32_0 : i32, i32
  }
  func.func @transform_1(%arg0: i32) -> (i32, i32) {
    %c0_i32 = arith.constant 0 : i32
    %c0_i32_0 = arith.constant 0 : i32
    %c0_i32_1 = arith.constant 0 : i32
    return %c0_i32, %c0_i32_0 : i32, i32
  }
  func.func @transform_2(%arg0: i32) -> (i32, i32) {
    %c0_i32 = arith.constant 0 : i32
    %c0_i32_0 = arith.constant 0 : i32
    %c0_i32_1 = arith.constant 0 : i32
    return %c0_i32, %c0_i32_0 : i32, i32
  }
  func.func @transform_3(%arg0: i32) -> (i32, i32) {
    %c0_i32 = arith.constant 0 : i32
    %c0_i32_0 = arith.constant 0 : i32
    %c0_i32_1 = arith.constant 0 : i32
    return %c0_i32, %c0_i32_0 : i32, i32
  }
  func.func @transform_4(%arg0: i32) -> (i32, i32) {
    %c0_i32 = arith.constant 0 : i32
    %c0_i32_0 = arith.constant 0 : i32
    %c0_i32_1 = arith.constant 0 : i32
    return %c0_i32, %c0_i32_0 : i32, i32
  }
  func.func @transform_5(%arg0: i32) -> (i32, i32) {
    %c0_i32 = arith.constant 0 : i32
    %c0_i32_0 = arith.constant 0 : i32
    %c0_i32_1 = arith.constant 0 : i32
    return %c0_i32, %c0_i32_0 : i32, i32
  }
  func.func @transform_6(%arg0: i32) -> (i32, i32) {
    %c0_i32 = arith.constant 0 : i32
    %c0_i32_0 = arith.constant 0 : i32
    return %c0_i32, %arg0 : i32, i32
  }
  func.func @transform_7(%arg0: i32) -> (i32, i32) {
    %c0_i32 = arith.constant 0 : i32
    %c0_i32_0 = arith.constant 0 : i32
    return %c0_i32, %arg0 : i32, i32
  }
  func.func @transform_8(%arg0: i32) -> (i32, i32) {
    %c0_i32 = arith.constant 0 : i32
    %c0_i32_0 = arith.constant 0 : i32
    %c0_i32_1 = arith.constant 0 : i32
    return %c0_i32, %c0_i32_0 : i32, i32
  }
  func.func @transform_9(%arg0: i32) -> (i32, i32) {
    %c0_i32 = arith.constant 0 : i32
    %c0_i32_0 = arith.constant 0 : i32
    %c0_i32_1 = arith.constant 0 : i32
    return %c0_i32, %c0_i32_0 : i32, i32
  }
  func.func @transform_10(%arg0: i32) -> (i32, i32) {
    %c0_i32 = arith.constant 0 : i32
    %c0_i32_0 = arith.constant 0 : i32
    %c0_i32_1 = arith.constant 0 : i32
    return %c0_i32, %c0_i32_0 : i32, i32
  }
}

</mosaic_0001>

<bundles_post_ra>
// kernel: decoder_rnn_forward.1
= control target key start
LH: loop header
LB: loop body
LE: loop exit
PB: predicated region body
PF: predicated region fallthrough
CT: control target
= control target key end

     0   :  { %v1627_v1 = vmov 0   ;;  %vm643_vm0 = vcmask 7168   ;;  %s2222_s4 = inlined_call_operand.vmem [shape: bf16[128,512], index: 4, kind: input, shape index: {}]   ;;  %s2223_s3 = inlined_call_operand.vmem [shape: bf16[128,512], index: 3, kind: input, shape index: {}]   ;;  %s2224_s1 = inlined_call_operand.vmem [shape: f32[8,128], index: 1, kind: input, shape index: {}, may-alias: {1,9}]   ;;  %s2225_s0 = inlined_call_operand.vmem [shape: bf16[8,128], index: 0, kind: input, shape index: {}]   ;;  %s2226_s6 = inlined_call_operand.vmem [shape: bf16[128,1024], index: 6, kind: input, shape index: {}]   ;;  %s2227_s5 = inlined_call_operand.vmem [shape: f32[1,512], index: 5, kind: input, shape index: {}]   ;;  %s2228_s2 = inlined_call_operand.vmem [shape: f32[8,128], index: 2, kind: input, shape index: {}, may-alias: {2,10}]   ;;  %s2229_s10 = inlined_call_operand.vmem [shape: f32[8,128], index: 10, kind: output, shape index: {2}, may-alias: {2,10}]   ;;  %s2230_s9 = inlined_call_operand.vmem [shape: f32[8,128], index: 9, kind: output, shape index: {1}, may-alias: {1,9}]   ;;  %s2231_s7 = inlined_call_operand.vmem [shape: f32[1,1024], index: 7, kind: input, shape index: {}]   ;;  %s2232_s8 = inlined_call_operand.vmem [shape: f32[8,1024], index: 8, kind: output, shape index: {0}]  }
   0x1   :  { %v1495_v0 = vld [vmem:[%s2222_s4 + $0x4] ss:$16 sps:$4 sm:$0xff]   ;;  %296 = vmatprep.mubr.bf16.mxu0 %v1627_v1  ;;  %337 = vmatprep.mubr.bf16.mxu1 %v1627_v1  ;;  %v1497_v2 = vld [vmem:[%s2222_s4 + $0xc] ss:$16 sps:$4 sm:$0xff]   ;;  %v1499_v3 = vld [vmem:[%s2222_s4] ss:$16 sps:$4 sm:$0xff]  }
   0x2   :  { %1493 = vset.pattern.permute.xlu0 %v1627_v1  ;;  %1494 = vset.pattern.permute.xlu1 %v1627_v1  ;;  %v1500_v4 = vld [vmem:[%s2222_s4 + $0x8] ss:$16 sps:$4 sm:$0xff]   ;;  %v1501_v5 = vld [vmem:[%s2222_s4 + $0x24] ss:$16 sps:$4 sm:$0xff]   ;;  %v1503_v6 = vld [vmem:[%s2222_s4 + $0x2c] ss:$16 sps:$4 sm:$0xff]  }
   0x3   :  { %264 = vmatprep.subr.bf16.mxu0 %v1495_v0  ;;  %305 = vmatprep.subr.bf16.mxu1 %v1497_v2  ;;  %v1505_v7 = vld [vmem:[%s2222_s4 + $0x20] ss:$16 sps:$4 sm:$0xff]   ;;  %v1506_v8 = vld [vmem:[%s2222_s4 + $0x28] ss:$16 sps:$4 sm:$0xff]   ;;  %v1507_v9 = vld [vmem:[%s2222_s4 + $0x44] ss:$16 sps:$4 sm:$0xff]  }
   0x4   :  { %265 = vmatpush1.bf16.msra.mxu0 %v1499_v3  ;;  %306 = vmatpush1.bf16.msra.mxu1 %v1500_v4  ;;  %v1509_v10 = vld [vmem:[%s2222_s4 + $0x4c] ss:$16 sps:$4 sm:$0xff]   ;;  %v1511_v11 = vld [vmem:[%s2222_s4 + $0x40] ss:$16 sps:$4 sm:$0xff]   ;;  %v1512_v12 = vld [vmem:[%s2222_s4 + $0x48] ss:$16 sps:$4 sm:$0xff]  }
   0x5   :  { %266 = vmatprep.subr.bf16.mxu0 %v1501_v5  ;;  %307 = vmatprep.subr.bf16.mxu1 %v1503_v6  ;;  %v1513_v13 = vld [vmem:[%s2222_s4 + $0x64] ss:$16 sps:$4 sm:$0xff]   ;;  %v1515_v14 = vld [vmem:[%s2222_s4 + $0x6c] ss:$16 sps:$4 sm:$0xff]   ;;  %v1517_v15 = vld [vmem:[%s2222_s4 + $0x60] ss:$16 sps:$4 sm:$0xff]  }
   0x6   :  { %v1518_v16 = vld [vmem:[%s2222_s4 + $0x68] ss:$16 sps:$4 sm:$0xff]   ;;  %v1519_v17 = vld [vmem:[%s2222_s4 + $0x84] ss:$16 sps:$4 sm:$0xff]   ;;  %v1521_v18 = vld [vmem:[%s2222_s4 + $0x8c] ss:$16 sps:$4 sm:$0xff]  }
   0x7   :  { %v1523_v19 = vld [vmem:[%s2222_s4 + $0x80] ss:$16 sps:$4 sm:$0xff]   ;;  %v1524_v20 = vld [vmem:[%s2222_s4 + $0x88] ss:$16 sps:$4 sm:$0xff]   ;;  %v1525_v21 = vld [vmem:[%s2222_s4 + $0xa4] ss:$16 sps:$4 sm:$0xff]  }
   0x8   :  { %267 = vmatpush1.bf16.msra.mxu0 %v1505_v7  ;;  %308 = vmatpush1.bf16.msra.mxu1 %v1506_v8  ;;  %v1527_v22 = vld [vmem:[%s2222_s4 + $0xac] ss:$16 sps:$4 sm:$0xff]   ;;  %v1529_v23 = vld [vmem:[%s2222_s4 + $0xa0] ss:$16 sps:$4 sm:$0xff]   ;;  %v1530_v24 = vld [vmem:[%s2222_s4 + $0xa8] ss:$16 sps:$4 sm:$0xff]  }
   0x9   :  { %268 = vmatprep.subr.bf16.mxu0 %v1507_v9  ;;  %309 = vmatprep.subr.bf16.mxu1 %v1509_v10  ;;  %v1531_v25 = vld [vmem:[%s2222_s4 + $0xc4] ss:$16 sps:$4 sm:$0xff]   ;;  %v1533_v26 = vld [vmem:[%s2222_s4 + $0xcc] ss:$16 sps:$4 sm:$0xff]   ;;  %v1535_v27 = vld [vmem:[%s2222_s4 + $0xc0] ss:$16 sps:$4 sm:$0xff]  }
   0xa   :  { %v1536_v28 = vld [vmem:[%s2222_s4 + $0xc8] ss:$16 sps:$4 sm:$0xff]   ;;  %v1537_v29 = vld [vmem:[%s2222_s4 + $0xe4] ss:$16 sps:$4 sm:$0xff]   ;;  %v1539_v30 = vld [vmem:[%s2222_s4 + $0xec] ss:$16 sps:$4 sm:$0xff]  }
   0xb   :  { %v1541_v31 = vld [vmem:[%s2222_s4 + $0xe0] ss:$16 sps:$4 sm:$0xff]   ;;  %v1542_v32 = vld [vmem:[%s2222_s4 + $0xe8] ss:$16 sps:$4 sm:$0xff]   ;;  %v1545_v34 = vld [vmem:[%s2223_s3 + $0x4] ss:$16 sps:$4 sm:$0xff]  }
   0xc   :  { %269 = vmatpush1.bf16.msra.mxu0 %v1511_v11  ;;  %310 = vmatpush1.bf16.msra.mxu1 %v1512_v12  ;;  %v70_v33 = vld [vmem:[%s2224_s1] sm:$0xff]  ;;  %v1548_v35 = vld [vmem:[%s2223_s3 + $0xc] ss:$16 sps:$4 sm:$0xff]   ;;  %v1546_v38 = vld [vmem:[%s2223_s3 + $0x8] ss:$16 sps:$4 sm:$0xff]  }
   0xd   :  { %270 = vmatprep.subr.bf16.mxu0 %v1513_v13  ;;  %311 = vmatprep.subr.bf16.mxu1 %v1515_v14  ;;  %v71_v36 = vpack.c.bf16 %v70_v33, %v70_v33  ;;  %v1543_v37 = vld [vmem:[%s2223_s3] ss:$16 sps:$4 sm:$0xff]   ;;  %v1551_v39 = vld [vmem:[%s2223_s3 + $0x24] ss:$16 sps:$4 sm:$0xff]   ;;  %v1554_v40 = vld [vmem:[%s2223_s3 + $0x2c] ss:$16 sps:$4 sm:$0xff]  }
   0xe   :  { %v1549_v41 = vld [vmem:[%s2223_s3 + $0x20] ss:$16 sps:$4 sm:$0xff]   ;;  %v1552_v42 = vld [vmem:[%s2223_s3 + $0x28] ss:$16 sps:$4 sm:$0xff]   ;;  %v1557_v43 = vld [vmem:[%s2223_s3 + $0x44] ss:$16 sps:$4 sm:$0xff]  }
   0xf   :  { %v1560_v44 = vld [vmem:[%s2223_s3 + $0x4c] ss:$16 sps:$4 sm:$0xff]   ;;  %v1555_v45 = vld [vmem:[%s2223_s3 + $0x40] ss:$16 sps:$4 sm:$0xff]   ;;  %v1558_v46 = vld [vmem:[%s2223_s3 + $0x48] ss:$16 sps:$4 sm:$0xff]  }
  0x10   :  { %271 = vmatpush1.bf16.msra.mxu0 %v1517_v15  ;;  %312 = vmatpush1.bf16.msra.mxu1 %v1518_v16  ;;  %v1563_v47 = vld [vmem:[%s2223_s3 + $0x64] ss:$16 sps:$4 sm:$0xff]   ;;  %v1566_v48 = vld [vmem:[%s2223_s3 + $0x6c] ss:$16 sps:$4 sm:$0xff]   ;;  %v1561_v49 = vld [vmem:[%s2223_s3 + $0x60] ss:$16 sps:$4 sm:$0xff]  }
  0x11   :  { %272 = vmatprep.subr.bf16.mxu0 %v1519_v17  ;;  %313 = vmatprep.subr.bf16.mxu1 %v1521_v18  ;;  %v1564_v50 = vld [vmem:[%s2223_s3 + $0x68] ss:$16 sps:$4 sm:$0xff]   ;;  %v1569_v51 = vld [vmem:[%s2223_s3 + $0x84] ss:$16 sps:$4 sm:$0xff]   ;;  %v1572_v52 = vld [vmem:[%s2223_s3 + $0x8c] ss:$16 sps:$4 sm:$0xff]  }
  0x12   :  { %v1567_v53 = vld [vmem:[%s2223_s3 + $0x80] ss:$16 sps:$4 sm:$0xff]   ;;  %v1570_v54 = vld [vmem:[%s2223_s3 + $0x88] ss:$16 sps:$4 sm:$0xff]   ;;  %v1575_v55 = vld [vmem:[%s2223_s3 + $0xa4] ss:$16 sps:$4 sm:$0xff]  }
  0x13   :  { %v1578_v56 = vld [vmem:[%s2223_s3 + $0xac] ss:$16 sps:$4 sm:$0xff]   ;;  %v1573_v57 = vld [vmem:[%s2223_s3 + $0xa0] ss:$16 sps:$4 sm:$0xff]   ;;  %v1576_v58 = vld [vmem:[%s2223_s3 + $0xa8] ss:$16 sps:$4 sm:$0xff]  }
  0x14   :  { %273 = vmatpush1.bf16.msra.mxu0 %v1523_v19  ;;  %314 = vmatpush1.bf16.msra.mxu1 %v1524_v20  ;;  %v1581_v59 = vld [vmem:[%s2223_s3 + $0xc4] ss:$16 sps:$4 sm:$0xff]   ;;  %v1584_v60 = vld [vmem:[%s2223_s3 + $0xcc] ss:$16 sps:$4 sm:$0xff]   ;;  %v1579_v61 = vld [vmem:[%s2223_s3 + $0xc0] ss:$16 sps:$4 sm:$0xff]  }
  0x15   :  { %274 = vmatprep.subr.bf16.mxu0 %v1525_v21  ;;  %315 = vmatprep.subr.bf16.mxu1 %v1527_v22  ;;  %v1582_v62 = vld [vmem:[%s2223_s3 + $0xc8] ss:$16 sps:$4 sm:$0xff]   ;;  %v1587_v63 = vld [vmem:[%s2223_s3 + $0xe4] ss:$16 sps:$4 sm:$0xff]   ;;  %v1590_v0 = vld [vmem:[%s2223_s3 + $0xec] ss:$16 sps:$4 sm:$0xff]  }
  0x16   :  { %v1585_v2 = vld [vmem:[%s2223_s3 + $0xe0] ss:$16 sps:$4 sm:$0xff]   ;;  %v1588_v3 = vld [vmem:[%s2223_s3 + $0xe8] ss:$16 sps:$4 sm:$0xff]  }
  0x17   :  { %v37_v4 = vld [vmem:[%s2225_s0] sm:$0xf]  ;;  %v648_v7 = vld [vmem:[%s2226_s6 + $0x8] sm:$0xff] }
  0x18   :  { %275 = vmatpush1.bf16.msra.mxu0 %v1529_v23  ;;  %316 = vmatpush1.bf16.msra.mxu1 %v1530_v24  ;;  %v647_v5 = vld [vmem:[%s2226_s6] sm:$0xff]  ;;  %v652_v9 = vld [vmem:[%s2226_s6 + $0x28] sm:$0xff] }
  0x19   :  { %276 = vmatprep.subr.bf16.mxu0 %v1531_v25  ;;  %317 = vmatprep.subr.bf16.mxu1 %v1533_v26  ;;  %v651_v6 = vld [vmem:[%s2226_s6 + $0x20] sm:$0xff]  ;;  %v1428_v11 = vcombine.low %v648_v7, %v652_v9  ;;  %v1429_v12 = vcombine.high %v648_v7, %v652_v9  ;;  %v656_v15 = vld [vmem:[%s2226_s6 + $0x48] sm:$0xff] }
  0x1a   :  { %v1427_v8 = vcombine.high %v647_v5, %v651_v6  ;;  %v1426_v10 = vcombine.low %v647_v5, %v651_v6  ;;  %v655_v13 = vld [vmem:[%s2226_s6 + $0x40] sm:$0xff]  ;;  %v660_v17 = vld [vmem:[%s2226_s6 + $0x68] sm:$0xff]  ;;  %v1995_v5 = vld [vmem:[%s2226_s6 + $0x30] sm:$0xff] }
  0x1b   :  { %v659_v14 = vld [vmem:[%s2226_s6 + $0x60] sm:$0xff]  ;;  %v1436_v19 = vcombine.low %v656_v15, %v660_v17  ;;  %v1437_v20 = vcombine.high %v656_v15, %v660_v17  ;;  %v664_v23 = vld [vmem:[%s2226_s6 + $0x88] sm:$0xff] }
  0x1c   :  { %277 = vmatpush1.bf16.msra.mxu0 %v1535_v27  ;;  %318 = vmatpush1.bf16.msra.mxu1 %v1536_v28  ;;  %v1435_v16 = vcombine.high %v655_v13, %v659_v14  ;;  %v1434_v18 = vcombine.low %v655_v13, %v659_v14  ;;  %v663_v21 = vld [vmem:[%s2226_s6 + $0x80] sm:$0xff]  ;;  %v668_v25 = vld [vmem:[%s2226_s6 + $0xa8] sm:$0xff] }
  0x1d   :  { %278 = vmatprep.subr.bf16.mxu0 %v1537_v29  ;;  %319 = vmatprep.subr.bf16.mxu1 %v1539_v30  ;;  %v667_v22 = vld [vmem:[%s2226_s6 + $0xa0] sm:$0xff]  ;;  %v1444_v27 = vcombine.low %v664_v23, %v668_v25  ;;  %v1445_v28 = vcombine.high %v664_v23, %v668_v25  ;;  %v676_v33 = vld [vmem:[%s2226_s6 + $0xe8] sm:$0xff] }
  0x1e   :  { %v1443_v24 = vcombine.high %v663_v21, %v667_v22  ;;  %v1442_v26 = vcombine.low %v663_v21, %v667_v22  ;;  %v671_v29 = vld [vmem:[%s2226_s6 + $0xc0] sm:$0xff]  ;;  %v590_v22 = vlaneseq }
  0x1f   :  { %v675_v30 = vld [vmem:[%s2226_s6 + $0xe0] sm:$0xff] }
  0x20   :  { %279 = vmatpush1.bf16.msra.mxu0 %v1541_v31  ;;  %320 = vmatpush1.bf16.msra.mxu1 %v1542_v32  ;;  %v672_v31 = vld [vmem:[%s2226_s6 + $0xc8] sm:$0xff]  ;;  %v1451_v32 = vcombine.high %v671_v29, %v675_v30  ;;  %v2015_v23 = vshrl.u32 %v590_v22, 7  ;;  %v588_v25 = vld [vmem:[%s2227_s5] sm:$0xf]  ;;  %v670_v22 = vld [vmem:[%s2226_s6 + $0xb8] sm:$0xff] }
  0x21   :  { %506 = vmatprep.subr.bf16.mxu0 %v1545_v34  ;;  %547 = vmatprep.subr.bf16.mxu1 %v1548_v35  ;;  %v1450_v34 = vcombine.low %v671_v29, %v675_v30  ;;  %v1452_v35 = vcombine.low %v672_v31, %v676_v33 }
  0x23   :  { %297 = vmatmul.mubr.bf16.vlgmr.msra.gmra.mrb[0].mxu0 %v71_v36  ;;  %338 = vmatmul.mubr.bf16.vlgmr.msra.gmra.mrb[0].mxu1 %v71_v36  ;;  %v1453_v36 = vcombine.high %v672_v31, %v676_v33 }
  0x24   :  { %507 = vmatpush1.bf16.msra.mxu0 %v1543_v37  ;;  %548 = vmatpush1.bf16.msra.mxu1 %v1546_v38  ;;  %v679_v37 = vld [vmem:[%s2226_s6 + $0x100] sm:$0xff] }
  0x25   :  { %508 = vmatprep.subr.bf16.mxu0 %v1551_v39  ;;  %549 = vmatprep.subr.bf16.mxu1 %v1554_v40  ;;  %v683_v38 = vld [vmem:[%s2226_s6 + $0x120] sm:$0xff]  ;;  %v680_v39 = vld [vmem:[%s2226_s6 + $0x108] sm:$0xff] }
  0x26   :  { %538 = vmatprep.mubr.bf16.mxu0 %v1627_v1  ;;  %579 = vmatprep.mubr.bf16.mxu1 %v1627_v1  ;;  %v1459_v40 = vcombine.high %v679_v37, %v683_v38 }
  0x28   :  { %509 = vmatpush1.bf16.msra.mxu0 %v1549_v41  ;;  %550 = vmatpush1.bf16.msra.mxu1 %v1552_v42  ;;  %v684_v41 = vld [vmem:[%s2226_s6 + $0x128] sm:$0xff]  ;;  %v1458_v42 = vcombine.low %v679_v37, %v683_v38  ;;  %v604_v37 = vsub.s32 3, %v2015_v23 }
  0x29   :  { %510 = vmatprep.subr.bf16.mxu0 %v1557_v43  ;;  %551 = vmatprep.subr.bf16.mxu1 %v1560_v44  ;;  %v1460_v43 = vcombine.low %v680_v39, %v684_v41  ;;  %v1461_v44 = vcombine.high %v680_v39, %v684_v41 }
  0x2c   :  { %511 = vmatpush1.bf16.msra.mxu0 %v1555_v45  ;;  %552 = vmatpush1.bf16.msra.mxu1 %v1558_v46  ;;  %v687_v45 = vld [vmem:[%s2226_s6 + $0x140] sm:$0xff] }
  0x2d   :  { %512 = vmatprep.subr.bf16.mxu0 %v1563_v47  ;;  %553 = vmatprep.subr.bf16.mxu1 %v1566_v48  ;;  %v691_v46 = vld [vmem:[%s2226_s6 + $0x160] sm:$0xff]  ;;  %v688_v47 = vld [vmem:[%s2226_s6 + $0x148] sm:$0xff] }
  0x2e   :  { %v1467_v48 = vcombine.high %v687_v45, %v691_v46 }
  0x30   :  { %513 = vmatpush1.bf16.msra.mxu0 %v1561_v49  ;;  %554 = vmatpush1.bf16.msra.mxu1 %v1564_v50  ;;  %v692_v49 = vld [vmem:[%s2226_s6 + $0x168] sm:$0xff]  ;;  %v1466_v50 = vcombine.low %v687_v45, %v691_v46  ;;  %v605_v46 = vrot.slane %v588_v25, %v604_v37 }
  0x31   :  { %514 = vmatprep.subr.bf16.mxu0 %v1569_v51  ;;  %555 = vmatprep.subr.bf16.mxu1 %v1572_v52  ;;  %v1468_v51 = vcombine.low %v688_v47, %v692_v49  ;;  %v1469_v52 = vcombine.high %v688_v47, %v692_v49  ;;  %v600_v47 = vsub.s32 2, %v2015_v23 }
  0x33   :  { %v601_v49 = vrot.slane %v588_v25, %v600_v47 }
  0x34   :  { %515 = vmatpush1.bf16.msra.mxu0 %v1567_v53  ;;  %556 = vmatpush1.bf16.msra.mxu1 %v1570_v54  ;;  %v695_v53 = vld [vmem:[%s2226_s6 + $0x180] sm:$0xff] }
  0x35   :  { %516 = vmatprep.subr.bf16.mxu0 %v1575_v55  ;;  %557 = vmatprep.subr.bf16.mxu1 %v1578_v56  ;;  %v699_v54 = vld [vmem:[%s2226_s6 + $0x1a0] sm:$0xff]  ;;  %v696_v55 = vld [vmem:[%s2226_s6 + $0x188] sm:$0xff] }
  0x36   :  { %v1475_v56 = vcombine.high %v695_v53, %v699_v54 }
  0x38   :  { %517 = vmatpush1.bf16.msra.mxu0 %v1573_v57  ;;  %558 = vmatpush1.bf16.msra.mxu1 %v1576_v58  ;;  %v700_v57 = vld [vmem:[%s2226_s6 + $0x1a8] sm:$0xff]  ;;  %v1474_v58 = vcombine.low %v695_v53, %v699_v54 }
  0x39   :  { %518 = vmatprep.subr.bf16.mxu0 %v1581_v59  ;;  %559 = vmatprep.subr.bf16.mxu1 %v1584_v60  ;;  %v1476_v59 = vcombine.low %v696_v55, %v700_v57  ;;  %v1477_v60 = vcombine.high %v696_v55, %v700_v57 }
  0x3c   :  { %519 = vmatpush1.bf16.msra.mxu0 %v1579_v61  ;;  %560 = vmatpush1.bf16.msra.mxu1 %v1582_v62  ;;  %v703_v61 = vld [vmem:[%s2226_s6 + $0x1c0] sm:$0xff] }
  0x3d   :  { %520 = vmatprep.subr.bf16.mxu0 %v1587_v63  ;;  %561 = vmatprep.subr.bf16.mxu1 %v1590_v0  ;;  %v707_v62 = vld [vmem:[%s2226_s6 + $0x1e0] sm:$0xff]  ;;  %v704_v63 = vld [vmem:[%s2226_s6 + $0x1c8] sm:$0xff] }
  0x3e   :  { %v1482_v0 = vcombine.low %v703_v61, %v707_v62 }
  0x40   :  { %521 = vmatpush1.bf16.msra.mxu0 %v1585_v2  ;;  %562 = vmatpush1.bf16.msra.mxu1 %v1588_v3  ;;  %v1483_v2 = vcombine.high %v703_v61, %v707_v62  ;;  %v708_v3 = vld [vmem:[%s2226_s6 + $0x1e8] sm:$0xff] }
  0x41   :  { %1073 = vmatprep.subr.bf16.mxu0 %v1427_v8  ;;  %1114 = vmatprep.subr.bf16.mxu1 %v1429_v12  ;;  %v1484_v6 = vcombine.low %v704_v63, %v708_v3  ;;  %v1485_v7 = vcombine.high %v704_v63, %v708_v3 }
  0x43   :  { %539 = vmatmul.mubr.bf16.vlgmr.msra.gmra.mrb[4].mxu0 %v37_v4  ;;  %580 = vmatmul.mubr.bf16.vlgmr.msra.gmra.mrb[4].mxu1 %v37_v4  ;;  %v1990_v4 = vld [vmem:[%s2226_s6 + $0x10] sm:$0xff] }
  0x44   :  { %1105 = vmatprep.mubr.bf16.mxu0 %v1627_v1  ;;  %1146 = vmatprep.mubr.bf16.mxu1 %v1627_v1  ;;  %v1430_v8 = vcombine.low %v1990_v4, %v1995_v5  ;;  %v1431_v9 = vcombine.high %v1990_v4, %v1995_v5  ;;  %v674_v4 = vld [vmem:[%s2226_s6 + $0xd8] sm:$0xff] }
  0x45   :  { %1074 = vmatpush1.bf16.msra.mxu0 %v1426_v10  ;;  %1115 = vmatpush1.bf16.msra.mxu1 %v1428_v11  ;;  %v2004_v10 = vld [vmem:[%s2226_s6 + $0x18] sm:$0xff] }
  0x46   :  { %1075 = vmatprep.subr.bf16.mxu0 %v1435_v16  ;;  %1116 = vmatprep.subr.bf16.mxu1 %v1437_v20  ;;  %v2009_v11 = vld [vmem:[%s2226_s6 + $0x38] sm:$0xff] }
  0x47   :  { %v1432_v12 = vcombine.low %v2004_v10, %v2009_v11  ;;  %v1433_v13 = vcombine.high %v2004_v10, %v2009_v11  ;;  %v678_v5 = vld [vmem:[%s2226_s6 + $0xf8] sm:$0xff] }
  0x49   :  { %1076 = vmatpush1.bf16.msra.mxu0 %v1434_v18  ;;  %1117 = vmatpush1.bf16.msra.mxu1 %v1436_v19 }
  0x4a   :  { %1077 = vmatprep.subr.bf16.mxu0 %v1443_v24  ;;  %1118 = vmatprep.subr.bf16.mxu1 %v1445_v28  ;;  %v592_v24 = vsub.s32 0, %v2015_v23 }
  0x4d   :  { %1078 = vmatpush1.bf16.msra.mxu0 %v1442_v26  ;;  %1119 = vmatpush1.bf16.msra.mxu1 %v1444_v27  ;;  %v596_v26 = vsub.s32 1, %v2015_v23  ;;  %v593_v27 = vrot.slane %v588_v25, %v592_v24 }
  0x4e   :  { %1079 = vmatprep.subr.bf16.mxu0 %v1451_v32  ;;  %1120 = vmatprep.subr.bf16.mxu1 %v1453_v36 }
  0x4f   :  { %v597_v30 = vrot.slane %v588_v25, %v596_v26 }
  0x51   :  { %1080 = vmatpush1.bf16.msra.mxu0 %v1450_v34  ;;  %1121 = vmatpush1.bf16.msra.mxu1 %v1452_v35 }
  0x52   :  { %1081 = vmatprep.subr.bf16.mxu0 %v1459_v40  ;;  %1122 = vmatprep.subr.bf16.mxu1 %v1461_v44 }
  0x55   :  { %1082 = vmatpush1.bf16.msra.mxu0 %v1458_v42  ;;  %1123 = vmatpush1.bf16.msra.mxu1 %v1460_v43 }
  0x56   :  { %1083 = vmatprep.subr.bf16.mxu0 %v1467_v48  ;;  %1124 = vmatprep.subr.bf16.mxu1 %v1469_v52 }
  0x59   :  { %1084 = vmatpush1.bf16.msra.mxu0 %v1466_v50  ;;  %1125 = vmatpush1.bf16.msra.mxu1 %v1468_v51 }
  0x5a   :  { %1085 = vmatprep.subr.bf16.mxu0 %v1475_v56  ;;  %1126 = vmatprep.subr.bf16.mxu1 %v1477_v60 }
  0x5d   :  { %1086 = vmatpush1.bf16.msra.mxu0 %v1474_v58  ;;  %1127 = vmatpush1.bf16.msra.mxu1 %v1476_v59  ;;  %v633_v58 = vld [vmem:[%s2228_s2] sm:$0xff] }
  0x5e   :  { %1087 = vmatprep.subr.bf16.mxu0 %v1483_v2  ;;  %1128 = vmatprep.subr.bf16.mxu1 %v1485_v7 }
  0x61   :  { %1088 = vmatpush1.bf16.msra.mxu0 %v1482_v0  ;;  %1129 = vmatpush1.bf16.msra.mxu1 %v1484_v6 }
  0x62   :  { %1155 = vmatprep.subr.bf16.mxu0 %v1431_v9  ;;  %1196 = vmatprep.subr.bf16.mxu1 %v1433_v13  ;;  %v657_v9 = vld [vmem:[%s2226_s6 + $0x50] sm:$0xff] }
  0x63   :  { %v661_v13 = vld [vmem:[%s2226_s6 + $0x70] sm:$0xff] }
  0x64   :  { %v1438_v25 = vcombine.low %v657_v9, %v661_v13 }
  0xf6   :  { %v298_v14 = vpop.f32.mrb[0].mxu0  ;;  %v339_v15 = vpop.f32.mrb[0].mxu1 }
  0xf7   :  { %v300_v16 = vpop.f32.mrb[1].mxu0  ;;  %v341_v17 = vpop.f32.mrb[1].mxu1 }
  0xf8   :  { %v302_v18 = vpop.f32.mrb[2].mxu0  ;;  %v343_v19 = vpop.f32.mrb[2].mxu1 }
  0xf9   :  { %v303_v20 = vpop.f32.mrb[3].mxu0  ;;  %v344_v21 = vpop.f32.mrb[3].mxu1  ;;  %v665_v18 = vld [vmem:[%s2226_s6 + $0x90] sm:$0xff] }
  0xfa   :  { %v669_v19 = vld [vmem:[%s2226_s6 + $0xb0] sm:$0xff]  ;;  %v666_v21 = vld [vmem:[%s2226_s6 + $0x98] sm:$0xff] }
  0xfb   :  { %v1448_v10 = vcombine.low %v666_v21, %v670_v22 }
 0x116   :  { %v540_v28 = vpop.f32.mrb[4].mxu0  ;;  %v581_v29 = vpop.f32.mrb[4].mxu1 }
 0x117   :  { %v541_v31 = vadd.f32 %v540_v28, %v298_v14  ;;  %v582_v32 = vadd.f32 %v581_v29, %v339_v15  ;;  %v542_v33 = vpop.f32.mrb[5].mxu0  ;;  %v583_v34 = vpop.f32.mrb[5].mxu1  ;;  %v658_v14 = vld [vmem:[%s2226_s6 + $0x58] sm:$0xff]  ;;  %v1447_v28 = vcombine.high %v665_v18, %v669_v19  ;;  %v1449_v29 = vcombine.high %v666_v21, %v670_v22 }
 0x118   :  { %v543_v35 = vadd.f32 %v542_v33, %v300_v16  ;;  %v584_v36 = vadd.f32 %v583_v34, %v341_v17  ;;  %v544_v38 = vpop.f32.mrb[6].mxu0  ;;  %v585_v39 = vpop.f32.mrb[6].mxu1  ;;  %v662_v15 = vld [vmem:[%s2226_s6 + $0x78] sm:$0xff]  ;;  %v1439_v16 = vcombine.high %v657_v9, %v661_v13  ;;  %v685_v33 = vld [vmem:[%s2226_s6 + $0x130] sm:$0xff]  ;;  %v739_v21 = vsub.s32 6, %v2015_v23 }
 0x119   :  { %v610_v40 = vadd.f32 %v593_v27, %v541_v31  ;;  %v545_v41 = vpop.f32.mrb[7].mxu0  ;;  %v586_v42 = vpop.f32.mrb[7].mxu1  ;;  %v612_v51 = vadd.f32 %v601_v49, %v582_v32  ;;  %v1441_v17 = vcombine.high %v658_v14, %v662_v15  ;;  %v1440_v27 = vcombine.low %v658_v14, %v662_v15  ;;  %v677_v31 = vld [vmem:[%s2226_s6 + $0xf0] sm:$0xff]  ;;  %v686_v34 = vld [vmem:[%s2226_s6 + $0x138] sm:$0xff] }
 0x11a   :  { %v611_v43 = vadd.f32 %v597_v30, %v543_v35  ;;  %v613_v48 = vadd.f32 %v605_v46, %v584_v36  ;;  %v673_v30 = vld [vmem:[%s2226_s6 + $0xd0] sm:$0xff]  ;;  %v1456_v36 = vcombine.low %v674_v4, %v678_v5  ;;  %v690_v42 = vld [vmem:[%s2226_s6 + $0x158] sm:$0xff]  ;;  %v735_v22 = vsub.s32 5, %v2015_v23 }
 0x11b   :  { %v1423_v44 = vmul.f32 -1.442695, %v610_v40  ;;  %v1455_v11 = vcombine.high %v673_v30, %v677_v31  ;;  %v681_v32 = vld [vmem:[%s2226_s6 + $0x110] sm:$0xff]  ;;  %v1454_v35 = vcombine.low %v673_v30, %v677_v31 }
 0x11c   :  { %v1424_v45 = vmul.f32 -1.442695, %v611_v43  ;;  %v1425_v50 = vmul.f32 -1.442695, %v613_v48  ;;  %v1463_v38 = vcombine.high %v681_v32, %v685_v33  ;;  %v689_v40 = vld [vmem:[%s2226_s6 + $0x150] sm:$0xff]  ;;  %v694_v43 = vld [vmem:[%s2226_s6 + $0x178] sm:$0xff] }
 0x11d   :  { %1591 = vpow2.f32 %v1423_v44  ;;  %v693_v41 = vld [vmem:[%s2226_s6 + $0x170] sm:$0xff]  ;;  %v1462_v44 = vcombine.low %v681_v32, %v685_v33  ;;  %v1473_v48 = vcombine.high %v690_v42, %v694_v43 }
 0x11e   :  { %1593 = vpow2.f32 %v1424_v45  ;;  %v1471_v46 = vcombine.high %v689_v40, %v693_v41  ;;  %v697_v49 = vld [vmem:[%s2226_s6 + $0x190] sm:$0xff] }
 0x11f   :  { %1595 = vpow2.f32 %v1425_v50  ;;  %v701_v50 = vld [vmem:[%s2226_s6 + $0x1b0] sm:$0xff] }
 0x120   :  { %1597 = vtanh.f32 %v612_v51  ;;  %v698_v51 = vld [vmem:[%s2226_s6 + $0x198] sm:$0xff] }
 0x127   :  { %v1592_v52 = vpop.eup %1591 }
 0x128   :  { %v1594_v53 = vpop.eup %1593  ;;  %v617_v54 = vadd.f32 1.0, %v1592_v52  ;;  %v702_v52 = vld [vmem:[%s2226_s6 + $0x1b8] sm:$0xff] }
 0x129   :  { %v623_v55 = vadd.f32 1.0, %v1594_v53  ;;  %v1596_v56 = vpop.eup %1595  ;;  %v1470_v53 = vcombine.low %v689_v40, %v693_v41 }
 0x12a   :  { %1599 = vrcp.f32 %v617_v54  ;;  %v1598_v57 = vpop.eup %1597  ;;  %v630_v62 = vadd.f32 1.0, %v1596_v56  ;;  %v1472_v54 = vcombine.low %v690_v42, %v694_v43  ;;  %v1481_v56 = vcombine.high %v698_v51, %v702_v52 }
 0x12b   :  { %1601 = vrcp.f32 %v623_v55  ;;  %v1479_v55 = vcombine.high %v697_v49, %v701_v50 }
 0x12c   :  { %1603 = vrcp.f32 %v630_v62  ;;  %v1480_v62 = vcombine.low %v698_v51, %v702_v52 }
 0x134   :  { %v1600_v59 = vpop.eup %1599 }
 0x135   :  { %v1602_v60 = vpop.eup %1601  ;;  %v635_v61 = vmul.f32 %v1600_v59, %v1598_v57  ;;  %v705_v57 = vld [vmem:[%s2226_s6 + $0x1d0] sm:$0xff]  ;;  %v706_v59 = vld [vmem:[%s2226_s6 + $0x1d8] sm:$0xff] }
 0x136   :  { %v634_v63 = vmul.f32 %v1602_v60, %v633_v58  ;;  %v1604_v2 = vpop.eup %1603  ;;  %v709_v58 = vld [vmem:[%s2226_s6 + $0x1f0] sm:$0xff]  ;;  %v710_v60 = vld [vmem:[%s2226_s6 + $0x1f8] sm:$0xff] }
 0x138   :  { %v636_v0 = vadd.f32 %v635_v61, %v634_v63  ;;  %v1478_v61 = vcombine.low %v697_v49, %v701_v50  ;;  %v1487_v63 = vcombine.high %v705_v57, %v709_v58 }
 0x13a   :  { %1605 = vtanh.f32 %v636_v0  ;;  %640 = vst [vmem:[%s2229_s10] sm:$0xff] %v636_v0  ;;  %v1489_v0 = vcombine.high %v706_v59, %v710_v60 }
 0x144   :  { %v1606_v3 = vpop.eup %1605 }
 0x145   :  { %v638_v6 = vmul.f32 %v1606_v3, %v1604_v2  ;;  %v1486_v2 = vcombine.low %v705_v57, %v709_v58  ;;  %v1488_v3 = vcombine.low %v706_v59, %v710_v60 }
 0x147   :  { %639 = vst [vmem:[%s2230_s9] sm:$0xff] %v638_v6  ;;  %v641_v7 = vpack.c.bf16 %v638_v6, %v638_v6  ;;  %v1628_v6 = vmov -1e+30  }
 0x148   :  { %644 = vst.msk [vmem:[#allocation3] sm:$0xff] %vm643_vm0, %v1628_v6 }
 0x149   :  { %642 = vst [vmem:[#allocation2] sm:$0xf] %v641_v7 }
 0x14f   :  { %v1250_v49 = vld [vmem:[#allocation3] sm:$0xff] }
 0x150   :  { %v2059_v20 = vld [vmem:[#allocation2] sm:$0xf] }
 0x151   :  { %1106 = vmatmul.mubr.bf16.vlgmr.msra.gmra.mrb[8].mxu0 %v2059_v20  ;;  %1147 = vmatmul.mubr.bf16.vlgmr.msra.gmra.mrb[8].mxu1 %v2059_v20 }
 0x152   :  { %1156 = vmatpush1.bf16.msra.mxu0 %v1430_v8  ;;  %1197 = vmatpush1.bf16.msra.mxu1 %v1432_v12  ;;  %v1446_v8 = vcombine.low %v665_v18, %v669_v19  ;;  %v1457_v12 = vcombine.high %v674_v4, %v678_v5  ;;  %v731_v19 = vsub.s32 4, %v2015_v23 }
 0x153   :  { %1157 = vmatprep.subr.bf16.mxu0 %v1439_v16  ;;  %1198 = vmatprep.subr.bf16.mxu1 %v1441_v17 }
 0x154   :  { %1187 = vmatprep.mubr.bf16.mxu0 %v1627_v1  ;;  %1228 = vmatprep.mubr.bf16.mxu1 %v1627_v1  ;;  %v682_v1 = vld [vmem:[%s2226_s6 + $0x118] sm:$0xff] }
 0x155   :  { %v1465_v39 = vcombine.high %v682_v1, %v686_v34  ;;  %v1464_v45 = vcombine.low %v682_v1, %v686_v34 }
 0x156   :  { %1158 = vmatpush1.bf16.msra.mxu0 %v1438_v25  ;;  %1199 = vmatpush1.bf16.msra.mxu1 %v1440_v27  ;;  %v743_v25 = vsub.s32 7, %v2015_v23 }
 0x157   :  { %1159 = vmatprep.subr.bf16.mxu0 %v1447_v28  ;;  %1200 = vmatprep.subr.bf16.mxu1 %v1449_v29 }
 0x15a   :  { %1160 = vmatpush1.bf16.msra.mxu0 %v1446_v8  ;;  %1201 = vmatpush1.bf16.msra.mxu1 %v1448_v10 }
 0x15b   :  { %1161 = vmatprep.subr.bf16.mxu0 %v1455_v11  ;;  %1202 = vmatprep.subr.bf16.mxu1 %v1457_v12 }
 0x15e   :  { %1162 = vmatpush1.bf16.msra.mxu0 %v1454_v35  ;;  %1203 = vmatpush1.bf16.msra.mxu1 %v1456_v36 }
 0x15f   :  { %1163 = vmatprep.subr.bf16.mxu0 %v1463_v38  ;;  %1204 = vmatprep.subr.bf16.mxu1 %v1465_v39 }
 0x162   :  { %1164 = vmatpush1.bf16.msra.mxu0 %v1462_v44  ;;  %1205 = vmatpush1.bf16.msra.mxu1 %v1464_v45 }
 0x163   :  { %1165 = vmatprep.subr.bf16.mxu0 %v1471_v46  ;;  %1206 = vmatprep.subr.bf16.mxu1 %v1473_v48  ;;  %v1629_v48 = vmov 0.0  }
 0x164   :  { %645 = vst.msk [vmem:[#allocation4] sm:$0xff] %vm643_vm0, %v1629_v48 }
 0x166   :  { %1166 = vmatpush1.bf16.msra.mxu0 %v1470_v53  ;;  %1207 = vmatpush1.bf16.msra.mxu1 %v1472_v54 }
 0x167   :  { %1167 = vmatprep.subr.bf16.mxu0 %v1479_v55  ;;  %1208 = vmatprep.subr.bf16.mxu1 %v1481_v56 }
 0x16a   :  { %1168 = vmatpush1.bf16.msra.mxu0 %v1478_v61  ;;  %1209 = vmatpush1.bf16.msra.mxu1 %v1480_v62 }
 0x16b   :  { %1169 = vmatprep.subr.bf16.mxu0 %v1487_v63  ;;  %1210 = vmatprep.subr.bf16.mxu1 %v1489_v0 }
 0x16e   :  { %1170 = vmatpush1.bf16.msra.mxu0 %v1486_v2  ;;  %1211 = vmatpush1.bf16.msra.mxu1 %v1488_v3 }
 0x171   :  { %1188 = vmatmul.mubr.bf16.vlgmr.msra.gmra.mrb[12].mxu0 %v2059_v20  ;;  %1229 = vmatmul.mubr.bf16.vlgmr.msra.gmra.mrb[12].mxu1 %v2059_v20  ;;  %v711_v20 = vld [vmem:[%s2231_s7] sm:$0xff] }
 0x172   :  { %v716_v27 = vrot.slane %v711_v20, %v592_v24  ;;  %v724_v28 = vrot.slane %v711_v20, %v600_v47  ;;  %v732_v29 = vrot.slane %v711_v20, %v731_v19  ;;  %v740_v30 = vrot.slane %v711_v20, %v739_v21 }
 0x173   :  { %v720_v31 = vrot.slane %v711_v20, %v596_v26  ;;  %v728_v4 = vrot.slane %v711_v20, %v604_v37  ;;  %v736_v5 = vrot.slane %v711_v20, %v735_v22  ;;  %v744_v8 = vrot.slane %v711_v20, %v743_v25 }
 0x224   :  { %v1107_v7 = vpop.f32.mrb[8].mxu0  ;;  %v1148_v9 = vpop.f32.mrb[8].mxu1 }
 0x225   :  { %v1109_v13 = vpop.f32.mrb[9].mxu0  ;;  %v1150_v14 = vpop.f32.mrb[9].mxu1  ;;  %v2155_v12 = vadd.f32 %v1107_v7, %v716_v27  ;;  %v2157_v32 = vadd.f32 %v1148_v9, %v724_v28 }
 0x226   :  { %v1111_v15 = vpop.f32.mrb[10].mxu0  ;;  %v1152_v16 = vpop.f32.mrb[10].mxu1  ;;  %v2163_v34 = vadd.f32 %v1109_v13, %v720_v31  ;;  %v2165_v26 = vadd.f32 %v1150_v14, %v728_v4 }
 0x227   :  { %v1112_v17 = vpop.f32.mrb[11].mxu0  ;;  %v1153_v18 = vpop.f32.mrb[11].mxu1 }
 0x244   :  { %v1189_v10 = vpop.f32.mrb[12].mxu0  ;;  %v1230_v11 = vpop.f32.mrb[12].mxu1 }
 0x245   :  { %v2159_v24 = vadd.f32 %v1189_v10, %v732_v29  ;;  %v2161_v33 = vadd.f32 %v1230_v11, %v740_v30  ;;  %v1191_v47 = vpop.f32.mrb[13].mxu0  ;;  %v1232_v1 = vpop.f32.mrb[13].mxu1 }
 0x246   :  { %v2167_v23 = vadd.f32 %v1191_v47, %v736_v5  ;;  %v2169_v37 = vadd.f32 %v1232_v1, %v744_v8  ;;  %v1193_v35 = vpop.f32.mrb[14].mxu0  ;;  %v1234_v36 = vpop.f32.mrb[14].mxu1  ;;  %v1261_v5 = vld [vmem:[#allocation4] sm:$0xff] }
 0x247   :  { %v1194_v38 = vpop.f32.mrb[15].mxu0  ;;  %v1235_v39 = vpop.f32.mrb[15].mxu1  ;;  %v1251_v40 = vmax.f32 %v2155_v12, %v2159_v24  ;;  %v1253_v41 = vmax.f32 %v2157_v32, %v2161_v33 }
 0x248   :  { %v1252_v42 = vmax.f32 %v2163_v34, %v2167_v23  ;;  %v1254_v43 = vmax.f32 %v2165_v26, %v2169_v37 }
 0x24a   :  { %v1255_v44 = vmax.f32 %v1251_v40, %v1252_v42  ;;  %v1256_v45 = vmax.f32 %v1253_v41, %v1254_v43 }
 0x24c   :  { %v1257_v46 = vmax.f32 %v1255_v44, %v1256_v45 }
 0x24e   :  { %1258 = vmax.xlane.f32.xlu0 %v1257_v46 }
 0x2db   :  { %v1259_v50 = vpop.xlane.xlu0 %1258 }
 0x2dc   :  { %v1260_v51 = vmax.f32 %v1250_v49, %v1259_v50 }
 0x2de   :  { %v1262_v52 = vsub.f32 %v1250_v49, %v1260_v51  ;;  %1307 = vst.msk [vmem:[#allocation3] sm:$0xff] %vm643_vm0, %v1260_v51  ;;  %1268 = vperm.xlu0 %1493, %v1260_v51  }
 0x2e0   :  { %v1263_v31 = vmul.f32 1.442695, %v1262_v52 }
 0x2e5   :  { %v1311_v36 = vld [vmem:[#allocation3] sm:$0xff] }
 0x35d   :  { %v1269_v53 = vpop.permute.xlu0 %1268 }
 0x35e   :  { %v1271_v54 = vsub.f32 %v2155_v12, %v1269_v53  ;;  %v1272_v55 = vsub.f32 %v2163_v34, %v1269_v53  ;;  %v1273_v56 = vsub.f32 %v2157_v32, %v1269_v53  ;;  %v1274_v57 = vsub.f32 %v2165_v26, %v1269_v53 }
 0x35f   :  { %v1275_v60 = vsub.f32 %v2159_v24, %v1269_v53  ;;  %v1276_v62 = vsub.f32 %v2167_v23, %v1269_v53  ;;  %v1277_v2 = vsub.f32 %v2161_v33, %v1269_v53  ;;  %v1278_v3 = vsub.f32 %v2169_v37, %v1269_v53 }
 0x360   :  { %v1279_v58 = vmul.f32 1.442695, %v1271_v54  ;;  %v1281_v59 = vmul.f32 1.442695, %v1272_v55  ;;  %v1283_v61 = vmul.f32 1.442695, %v1273_v56 }
 0x361   :  { %v1285_v63 = vmul.f32 1.442695, %v1274_v57  ;;  %v1287_v0 = vmul.f32 1.442695, %v1275_v60  ;;  %v1289_v6 = vmul.f32 1.442695, %v1276_v62 }
 0x362   :  { %1607 = vpow2.f32 %v1279_v58  ;;  %v1291_v7 = vmul.f32 1.442695, %v1277_v2  ;;  %v1293_v9 = vmul.f32 1.442695, %v1278_v3 }
 0x363   :  { %1609 = vpow2.f32 %v1281_v59 }
 0x364   :  { %1611 = vpow2.f32 %v1283_v61 }
 0x365   :  { %1613 = vpow2.f32 %v1285_v63 }
 0x366   :  { %1615 = vpow2.f32 %v1287_v0 }
 0x367   :  { %1617 = vpow2.f32 %v1289_v6 }
 0x368   :  { %1619 = vpow2.f32 %v1291_v7 }
 0x369   :  { %1621 = vpow2.f32 %v1293_v9 }
 0x36a   :  { %1623 = vpow2.f32 %v1263_v31 }
 0x36c   :  { %v1608_v13 = vpop.eup %1607 }
 0x36d   :  { %v1610_v14 = vpop.eup %1609 }
 0x36e   :  { %v1295_v15 = vadd.f32 %v1610_v14, %v1608_v13  ;;  %v1612_v16 = vpop.eup %1611 }
 0x36f   :  { %v1614_v18 = vpop.eup %1613 }
 0x370   :  { %v1296_v17 = vadd.f32 %v1612_v16, %v1295_v15  ;;  %v1616_v21 = vpop.eup %1615 }
 0x371   :  { %v1618_v22 = vpop.eup %1617 }
 0x372   :  { %v1297_v19 = vadd.f32 %v1614_v18, %v1296_v17  ;;  %v1620_v27 = vpop.eup %1619 }
 0x373   :  { %v1622_v29 = vpop.eup %1621 }
 0x374   :  { %v1298_v20 = vadd.f32 %v1616_v21, %v1297_v19  ;;  %v1624_v4 = vpop.eup %1623 }
 0x375   :  { %v1265_v8 = vmul.f32 %v1624_v4, %v1261_v5 }
 0x376   :  { %v1299_v25 = vadd.f32 %v1618_v22, %v1298_v20 }
 0x378   :  { %v1300_v28 = vadd.f32 %v1620_v27, %v1299_v25 }
 0x37a   :  { %v1301_v30 = vadd.f32 %v1622_v29, %v1300_v28 }
 0x37c   :  { %1302 = vadd.xlane.f32.xlu1 %v1301_v30 }
 0x409   :  { %v1303_v10 = vpop.xlane.xlu1 %1302 }
 0x40a   :  { %v1304_v11 = vadd.f32 %v1303_v10, %v1265_v8 }
 0x40c   :  { %1306 = vst.msk [vmem:[#allocation4] sm:$0xff] %vm643_vm0, %v1304_v11 }
 0x413   :  { %v1312_v47 = vld [vmem:[#allocation4] sm:$0xff] }
 0x414   :  { %1625 = vlog2.f32 %v1312_v47 }
 0x41e   :  { %v1626_v1 = vpop.eup %1625 }
 0x41f   :  { %v1314_v35 = vmul.f32 0.6931472, %v1626_v1 }
 0x421   :  { %v1315_v38 = vadd.f32 %v1314_v35, %v1311_v36 }
 0x423   :  { %1326 = vperm.xlu1 %1494, %v1315_v38  }
 0x4a2   :  { %v1327_v39 = vpop.permute.xlu1 %1326 }
 0x4a3   :  { %v1329_v40 = vsub.f32 %v2155_v12, %v1327_v39  ;;  %v1330_v41 = vsub.f32 %v2163_v34, %v1327_v39  ;;  %v1331_v42 = vsub.f32 %v2157_v32, %v1327_v39  ;;  %v1332_v43 = vsub.f32 %v2165_v26, %v1327_v39 }
 0x4a4   :  { %v1333_v44 = vsub.f32 %v2159_v24, %v1327_v39  ;;  %v1334_v45 = vsub.f32 %v2167_v23, %v1327_v39  ;;  %v1335_v46 = vsub.f32 %v2161_v33, %v1327_v39  ;;  %v1336_v48 = vsub.f32 %v2169_v37, %v1327_v39 }
 0x4a5   :  { %1337 = vst [vmem:[%s2232_s8] sm:$0xff] %v1329_v40  ;;  %1338 = vst [vmem:[%s2232_s8 + $0x8] sm:$0xff] %v1330_v41 }
 0x4a6   :  { %1339 = vst [vmem:[%s2232_s8 + $0x10] sm:$0xff] %v1331_v42  ;;  %1340 = vst [vmem:[%s2232_s8 + $0x18] sm:$0xff] %v1332_v43 }
 0x4a7   :  { %1341 = vst [vmem:[%s2232_s8 + $0x20] sm:$0xff] %v1333_v44  ;;  %1342 = vst [vmem:[%s2232_s8 + $0x28] sm:$0xff] %v1334_v45 }
 0x4a8   :  { %1343 = vst [vmem:[%s2232_s8 + $0x30] sm:$0xff] %v1335_v46  ;;  %1344 = vst [vmem:[%s2232_s8 + $0x38] sm:$0xff] %v1336_v48 }

</bundles_post_ra>
